<compile_context>
chip_gen: v6e
topology: v6e:2x2x1
jax: 0.10.0
libtpu: 0.0.40
codegen_flags: <defaults>
</compile_context>

<pallas_src>
import functools

import jax
import jax.numpy as jnp
from jax.experimental import pallas as pl
from jax.experimental.pallas import tpu as pltpu


def _round_up(x, m):
    return ((x + m - 1) // m) * m


def _actor_kernel(x_ref, w1_ref, b1_ref, w2_ref, b2_ref, wh_ref, bh_ref,
                  lo_ref, hi_ref, out_ref):
    mdt = w1_ref.dtype                      # matmul operand dtype (bf16 or f32)
    x = x_ref[...].astype(mdt)

    # fc1 + relu (f32 accumulation regardless of operand dtype)
    h1 = jnp.dot(x, w1_ref[...], preferred_element_type=jnp.float32)
    h1 = jnp.maximum(h1 + b1_ref[...], 0.0).astype(mdt)

    # fc2 + relu
    h2 = jnp.dot(h1, w2_ref[...], preferred_element_type=jnp.float32)
    h2 = jnp.maximum(h2 + b2_ref[...], 0.0).astype(mdt)

    # fused mu|sigma head (output lane-padded to 128) + per-column clamp:
    # lo/hi are (1, head_pad) rows: sigma cols get [1e-6, 1.0], everything else
    # [-inf, +inf] so mu and pad columns pass through untouched.
    y = jnp.dot(h2, wh_ref[...], preferred_element_type=jnp.float32) + bh_ref[...]
    y = jnp.minimum(jnp.maximum(y, lo_ref[...]), hi_ref[...])

    out_ref[...] = y.astype(out_ref.dtype)  # single lane-dense (tm, 128) store


def prepare_actor_params(params, *, matmul_dtype=jnp.bfloat16, reparam_noise=1e-6):
    """One-time (per parameter update) preparation for actor_forward:
       * fuse mu/sigma head weights, lane-pad to a multiple of 128,
       * build the per-column clamp rows (lo/hi),
       * cast matmul operand weights to `matmul_dtype` (biases stay f32)."""
    fc2 = params["w2"].shape[1]
    n_actions = params["wmu"].shape[1]
    head = 2 * n_actions
    head_pad = max(128, 128 * pl.cdiv(head, 128))

    wh = jnp.zeros((fc2, head_pad), jnp.float32)
    wh = wh.at[:, :n_actions].set(params["wmu"])
    wh = wh.at[:, n_actions:head].set(params["wsig"])
    bh = jnp.zeros((1, head_pad), jnp.float32)
    bh = bh.at[:, :n_actions].set(params["bmu"])
    bh = bh.at[:, n_actions:head].set(params["bsig"])

    lo = jnp.full((1, head_pad), -jnp.inf, jnp.float32)
    lo = lo.at[:, n_actions:head].set(jnp.float32(reparam_noise))
    hi = jnp.full((1, head_pad), jnp.inf, jnp.float32)
    hi = hi.at[:, n_actions:head].set(jnp.float32(1.0))

    return dict(
        w1=params["w1"].astype(matmul_dtype), b1=params["b1"].astype(jnp.float32),
        w2=params["w2"].astype(matmul_dtype), b2=params["b2"].astype(jnp.float32),
        wh=wh.astype(matmul_dtype), bh=bh,
        lo=lo, hi=hi,
        n_actions=n_actions, head_pad=head_pad,
    )


def actor_forward(state, prepared, *, batch_tile=512):
    """Pallas ActorNetwork.forward.

    state:    (B, input_dim) float32
    prepared: output of prepare_actor_params(params)
    returns:  (mu, sigma) each (B, n_actions) float32
    """
    B, d_in = state.shape
    fc1 = prepared["w1"].shape[1]
    fc2 = prepared["w2"].shape[1]
    head_pad = prepared["head_pad"]
    n_actions = prepared["n_actions"]

    # Batch tiling.  tm is a multiple of 8 (sublane) or equal to B itself.
    # For medium batches we aim for >=2 grid steps so the "parallel" batch axis
    # can shard across both TensorCores on v7x.  No padding copy of `state`:
    # the ragged last block uses Pallas' masked writeback.
    if B <= batch_tile:
        tm = _round_up(pl.cdiv(B, 2), 8) if B >= 16 else B
    else:
        tm = batch_tile
    grid_m = pl.cdiv(B, tm)

    in_specs = [
        pl.BlockSpec((tm, d_in), lambda i: (i, 0)),        # state tile
        pl.BlockSpec((d_in, fc1), lambda i: (0, 0)),       # W1 (pinned in VMEM)
        pl.BlockSpec((1, fc1), lambda i: (0, 0)),          # b1
        pl.BlockSpec((fc1, fc2), lambda i: (0, 0)),        # W2 (pinned)
        pl.BlockSpec((1, fc2), lambda i: (0, 0)),          # b2
        pl.BlockSpec((fc2, head_pad), lambda i: (0, 0)),   # fused head W (pinned)
        pl.BlockSpec((1, head_pad), lambda i: (0, 0)),     # fused head b
        pl.BlockSpec((1, head_pad), lambda i: (0, 0)),     # clamp lo
        pl.BlockSpec((1, head_pad), lambda i: (0, 0)),     # clamp hi
    ]
    out_specs = pl.BlockSpec((tm, head_pad), lambda i: (i, 0))

    rows = grid_m * tm
    wbytes = prepared["w1"].dtype.itemsize
    flops = 2 * rows * (d_in * fc1 + fc1 * fc2 + fc2 * head_pad)
    bytes_accessed = (4 * (rows * d_in + fc1 + fc2 + head_pad * 3 + rows * head_pad)
                      + wbytes * (d_in * fc1 + fc1 * fc2 + fc2 * head_pad))

    y = pl.pallas_call(
        _actor_kernel,
        out_shape=jax.ShapeDtypeStruct((B, head_pad), jnp.float32),
        grid=(grid_m,),
        in_specs=in_specs,
        out_specs=out_specs,
        compiler_params=pltpu.CompilerParams(
            dimension_semantics=("parallel",)),
        cost_estimate=pl.CostEstimate(flops=flops, transcendentals=0,
                                      bytes_accessed=bytes_accessed),
    )(state, prepared["w1"], prepared["b1"], prepared["w2"], prepared["b2"],
      prepared["wh"], prepared["bh"], prepared["lo"], prepared["hi"])

    mu = y[:, :n_actions]
    sigma = y[:, n_actions:2 * n_actions]
    return mu, sigma


def init_actor_params(key, input_dim, fc1_dims=256, fc2_dims=256, n_actions=2):
    """Deterministic init mimicking PyTorch nn.Linear default:
    U(-1/sqrt(fan_in), 1/sqrt(fan_in)) for both weight and bias."""
    def linear(k, fan_in, fan_out):
        kw, kb = jax.random.split(k)
        bound = 1.0 / jnp.sqrt(jnp.float32(fan_in))
        w = jax.random.uniform(kw, (fan_in, fan_out), jnp.float32, -bound, bound)
        b = jax.random.uniform(kb, (1, fan_out), jnp.float32, -bound, bound)
        return w, b

    k1, k2, k3, k4 = jax.random.split(key, 4)
    w1, b1 = linear(k1, input_dim, fc1_dims)
    w2, b2 = linear(k2, fc1_dims, fc2_dims)
    wmu, bmu = linear(k3, fc2_dims, n_actions)
    wsig, bsig = linear(k4, fc2_dims, n_actions)
    return dict(w1=w1, b1=b1, w2=w2, b2=b2,
                wmu=wmu, bmu=bmu, wsig=wsig, bsig=bsig)


def actor_forward_ref(state, params, *, reparam_noise=1e-6):
    """Plain-JAX reference for correctness checking."""
    h1 = jnp.maximum(state @ params["w1"] + params["b1"], 0.0)
    h2 = jnp.maximum(h1 @ params["w2"] + params["b2"], 0.0)
    mu = h2 @ params["wmu"] + params["bmu"]
    sigma = jnp.clip(h2 @ params["wsig"] + params["bsig"], reparam_noise, 1.0)
    return mu, sigma


if __name__ == "__main__":
    # TODO(synk): sample_normal() (rsample + tanh squash + log_prob), the Adam
    # optimizer and checkpoint I/O live outside forward(); only forward() is a kernel.
    key = jax.random.PRNGKey(0)
    k_params, k_state, k_state2 = jax.random.split(key, 3)

    batch = 8
    input_dim = 8          # e.g. an 8-dim observation: input_dims=(8,)
    n_actions = 2

    params = init_actor_params(k_params, input_dim, 256, 256, n_actions)
    state = jax.random.normal(k_state, (batch, input_dim), jnp.float32)

    # One-time preparation (head fusion, clamp rows, weight cast) -- hoisted out
    # of the per-call hot path.
    prep_bf16 = prepare_actor_params(params)                              # default bf16
    prep_f32 = prepare_actor_params(params, matmul_dtype=jnp.float32)     # debug path
    jax.block_until_ready((prep_bf16, prep_f32))

    mu_ref, sigma_ref = actor_forward_ref(state, params)
    # Clamp floor is float32(1e-6) ~= 9.9999997e-07 (slightly below the double 1e-6).
    eps32 = float(jnp.float32(1e-6))

    # f32 path
    mu, sigma = actor_forward(state, prep_f32)
    jax.block_until_ready((mu, sigma))
    assert mu.shape == (batch, n_actions) and sigma.shape == (batch, n_actions)
    assert jnp.allclose(mu, mu_ref, atol=1e-3, rtol=1e-3)
    assert jnp.allclose(sigma, sigma_ref, atol=1e-3, rtol=1e-3)
    assert float(sigma.min()) >= eps32 and float(sigma.max()) <= 1.0

    # bf16-matmul path (MXU-native; default). Accumulation stays f32.
    mu_bf, sigma_bf = actor_forward(state, prep_bf16)
    jax.block_until_ready((mu_bf, sigma_bf))
    assert jnp.allclose(mu_bf, mu_ref, atol=5e-2, rtol=5e-2)
    assert jnp.allclose(sigma_bf, sigma_ref, atol=5e-2, rtol=5e-2)
    assert float(sigma_bf.min()) >= eps32 and float(sigma_bf.max()) <= 1.0

    # Grid-tiled batch path (300 rows -> tm=152, 2 parallel steps, ragged last block).
    big_state = jax.random.normal(k_state2, (300, input_dim), jnp.float32)
    mu_b, sigma_b = actor_forward(big_state, prep_f32)
    jax.block_until_ready((mu_b, sigma_b))
    mu_b_ref, sigma_b_ref = actor_forward_ref(big_state, params)
    assert mu_b.shape == (300, n_actions) and sigma_b.shape == (300, n_actions)
    assert jnp.allclose(mu_b, mu_b_ref, atol=1e-3, rtol=1e-3)
    assert jnp.allclose(sigma_b, sigma_b_ref, atol=1e-3, rtol=1e-3)
    assert float(sigma_b.min()) >= eps32 and float(sigma_b.max()) <= 1.0

    # Same large batch on the bf16 path.
    mu_bb, sigma_bb = actor_forward(big_state, prep_bf16)
    jax.block_until_ready((mu_bb, sigma_bb))
    assert jnp.allclose(mu_bb, mu_b_ref, atol=5e-2, rtol=5e-2)
    assert jnp.allclose(sigma_bb, sigma_b_ref, atol=5e-2, rtol=5e-2)

    print("KERNEL_OK")
</pallas_src>

<mosaic_0001>
module attributes {stable_mosaic.version = 11 : i64} {
  func.func @_actor_kernel(%arg0: i32, %arg1: memref<8x8xf32, #tpu.memory_space<vmem>>, %arg2: memref<8x256xf32, #tpu.memory_space<vmem>>, %arg3: memref<1x256xf32, #tpu.memory_space<vmem>>, %arg4: memref<256x256xf32, #tpu.memory_space<vmem>>, %arg5: memref<1x256xf32, #tpu.memory_space<vmem>>, %arg6: memref<256x128xf32, #tpu.memory_space<vmem>>, %arg7: memref<1x128xf32, #tpu.memory_space<vmem>>, %arg8: memref<1x128xf32, #tpu.memory_space<vmem>>, %arg9: memref<1x128xf32, #tpu.memory_space<vmem>>, %arg10: memref<8x128xf32, #tpu.memory_space<vmem>>) attributes {dimension_semantics = [#tpu.dimension_semantics<parallel>], iteration_bounds = array<i64: 1>, scalar_prefetch = 0 : i64, scratch_operands = 0 : i64, tpu.core_type = #tpu.core_type<tc>, window_params = [{transform_indices = @transform_0, window_bounds = array<i64: 8, 8>}, {pipeline_mode = #tpu.pipeline_mode<synchronous>, transform_indices = @transform_1, window_bounds = array<i64: 8, 256>}, {pipeline_mode = #tpu.pipeline_mode<synchronous>, transform_indices = @transform_2, window_bounds = array<i64: 1, 256>}, {pipeline_mode = #tpu.pipeline_mode<synchronous>, transform_indices = @transform_3, window_bounds = array<i64: 256, 256>}, {pipeline_mode = #tpu.pipeline_mode<synchronous>, transform_indices = @transform_4, window_bounds = array<i64: 1, 256>}, {pipeline_mode = #tpu.pipeline_mode<synchronous>, transform_indices = @transform_5, window_bounds = array<i64: 256, 128>}, {pipeline_mode = #tpu.pipeline_mode<synchronous>, transform_indices = @transform_6, window_bounds = array<i64: 1, 128>}, {pipeline_mode = #tpu.pipeline_mode<synchronous>, transform_indices = @transform_7, window_bounds = array<i64: 1, 128>}, {pipeline_mode = #tpu.pipeline_mode<synchronous>, transform_indices = @transform_8, window_bounds = array<i64: 1, 128>}, {transform_indices = @transform_9, window_bounds = array<i64: 8, 128>}]} {
    %c0 = arith.constant 0 : index
    %c0_0 = arith.constant 0 : index
    %0 = vector.load %arg1[%c0, %c0_0] : memref<8x8xf32, #tpu.memory_space<vmem>>, vector<8x8xf32>
    %c0_1 = arith.constant 0 : index
    %c0_2 = arith.constant 0 : index
    %1 = vector.load %arg2[%c0_1, %c0_2] : memref<8x256xf32, #tpu.memory_space<vmem>>, vector<8x256xf32>
    %cst = arith.constant dense<0.000000e+00> : vector<8x256xf32>
    %2 = tpu.matmul %0, %1, %cst {dimension_numbers = #tpu.dot_dimension_numbers<[1], [0], [0], [1], [0, 0, 1, 1], [], []>} : vector<8x8xf32>, vector<8x256xf32>, vector<8x256xf32> -> vector<8x256xf32>
    %c0_3 = arith.constant 0 : index
    %c0_4 = arith.constant 0 : index
    %3 = vector.load %arg3[%c0_3, %c0_4] : memref<1x256xf32, #tpu.memory_space<vmem>>, vector<1x256xf32>
    %4 = vector.broadcast %3 : vector<1x256xf32> to vector<8x256xf32>
    %5 = arith.addf %2, %4 : vector<8x256xf32>
    %cst_5 = arith.constant 0.000000e+00 : f32
    %6 = vector.broadcast %cst_5 : f32 to vector<8x256xf32>
    %7 = arith.maximumf %5, %6 : vector<8x256xf32>
    %c0_6 = arith.constant 0 : index
    %c0_7 = arith.constant 0 : index
    %8 = vector.load %arg4[%c0_6, %c0_7] : memref<256x256xf32, #tpu.memory_space<vmem>>, vector<256x256xf32>
    %cst_8 = arith.constant dense<0.000000e+00> : vector<8x256xf32>
    %9 = tpu.matmul %7, %8, %cst_8 {dimension_numbers = #tpu.dot_dimension_numbers<[1], [0], [0], [1], [0, 0, 1, 1], [], []>} : vector<8x256xf32>, vector<256x256xf32>, vector<8x256xf32> -> vector<8x256xf32>
    %c0_9 = arith.constant 0 : index
    %c0_10 = arith.constant 0 : index
    %10 = vector.load %arg5[%c0_9, %c0_10] : memref<1x256xf32, #tpu.memory_space<vmem>>, vector<1x256xf32>
    %11 = vector.broadcast %10 : vector<1x256xf32> to vector<8x256xf32>
    %12 = arith.addf %9, %11 : vector<8x256xf32>
    %cst_11 = arith.constant 0.000000e+00 : f32
    %13 = vector.broadcast %cst_11 : f32 to vector<8x256xf32>
    %14 = arith.maximumf %12, %13 : vector<8x256xf32>
    %c0_12 = arith.constant 0 : index
    %c0_13 = arith.constant 0 : index
    %15 = vector.load %arg6[%c0_12, %c0_13] : memref<256x128xf32, #tpu.memory_space<vmem>>, vector<256x128xf32>
    %cst_14 = arith.constant dense<0.000000e+00> : vector<8x128xf32>
    %16 = tpu.matmul %14, %15, %cst_14 {dimension_numbers = #tpu.dot_dimension_numbers<[1], [0], [0], [1], [0, 0, 1, 1], [], []>} : vector<8x256xf32>, vector<256x128xf32>, vector<8x128xf32> -> vector<8x128xf32>
    %c0_15 = arith.constant 0 : index
    %c0_16 = arith.constant 0 : index
    %17 = vector.load %arg7[%c0_15, %c0_16] : memref<1x128xf32, #tpu.memory_space<vmem>>, vector<1x128xf32>
    %18 = vector.broadcast %17 : vector<1x128xf32> to vector<8x128xf32>
    %19 = arith.addf %16, %18 : vector<8x128xf32>
    %c0_17 = arith.constant 0 : index
    %c0_18 = arith.constant 0 : index
    %20 = vector.load %arg8[%c0_17, %c0_18] : memref<1x128xf32, #tpu.memory_space<vmem>>, vector<1x128xf32>
    %21 = vector.broadcast %20 : vector<1x128xf32> to vector<8x128xf32>
    %22 = arith.maximumf %19, %21 : vector<8x128xf32>
    %c0_19 = arith.constant 0 : index
    %c0_20 = arith.constant 0 : index
    %23 = vector.load %arg9[%c0_19, %c0_20] : memref<1x128xf32, #tpu.memory_space<vmem>>, vector<1x128xf32>
    %24 = vector.broadcast %23 : vector<1x128xf32> to vector<8x128xf32>
    %25 = arith.minimumf %22, %24 : vector<8x128xf32>
    %c0_21 = arith.constant 0 : index
    %c0_22 = arith.constant 0 : index
    %26 = vector.load %arg10[%c0_21, %c0_22] : memref<8x128xf32, #tpu.memory_space<vmem>>, vector<8x128xf32>
    tpu.vector_store %arg10[%c0_21, %c0_22], %25 {strides = array<i32>} : memref<8x128xf32, #tpu.memory_space<vmem>>, vector<8x128xf32>,
    return
  }
  func.func @transform_0(%arg0: i32) -> (i32, i32) {
    %c0_i32 = arith.constant 0 : i32
    %c0_i32_0 = arith.constant 0 : i32
    return %arg0, %c0_i32 : i32, i32
  }
  func.func @transform_1(%arg0: i32) -> (i32, i32) {
    %c0_i32 = arith.constant 0 : i32
    %c0_i32_0 = arith.constant 0 : i32
    %c0_i32_1 = arith.constant 0 : i32
    return %c0_i32, %c0_i32_0 : i32, i32
  }
  func.func @transform_2(%arg0: i32) -> (i32, i32) {
    %c0_i32 = arith.constant 0 : i32
    %c0_i32_0 = arith.constant 0 : i32
    %c0_i32_1 = arith.constant 0 : i32
    return %c0_i32, %c0_i32_0 : i32, i32
  }
  func.func @transform_3(%arg0: i32) -> (i32, i32) {
    %c0_i32 = arith.constant 0 : i32
    %c0_i32_0 = arith.constant 0 : i32
    %c0_i32_1 = arith.constant 0 : i32
    return %c0_i32, %c0_i32_0 : i32, i32
  }
  func.func @transform_4(%arg0: i32) -> (i32, i32) {
    %c0_i32 = arith.constant 0 : i32
    %c0_i32_0 = arith.constant 0 : i32
    %c0_i32_1 = arith.constant 0 : i32
    return %c0_i32, %c0_i32_0 : i32, i32
  }
  func.func @transform_5(%arg0: i32) -> (i32, i32) {
    %c0_i32 = arith.constant 0 : i32
    %c0_i32_0 = arith.constant 0 : i32
    %c0_i32_1 = arith.constant 0 : i32
    return %c0_i32, %c0_i32_0 : i32, i32
  }
  func.func @transform_6(%arg0: i32) -> (i32, i32) {
    %c0_i32 = arith.constant 0 : i32
    %c0_i32_0 = arith.constant 0 : i32
    %c0_i32_1 = arith.constant 0 : i32
    return %c0_i32, %c0_i32_0 : i32, i32
  }
  func.func @transform_7(%arg0: i32) -> (i32, i32) {
    %c0_i32 = arith.constant 0 : i32
    %c0_i32_0 = arith.constant 0 : i32
    %c0_i32_1 = arith.constant 0 : i32
    return %c0_i32, %c0_i32_0 : i32, i32
  }
  func.func @transform_8(%arg0: i32) -> (i32, i32) {
    %c0_i32 = arith.constant 0 : i32
    %c0_i32_0 = arith.constant 0 : i32
    %c0_i32_1 = arith.constant 0 : i32
    return %c0_i32, %c0_i32_0 : i32, i32
  }
  func.func @transform_9(%arg0: i32) -> (i32, i32) {
    %c0_i32 = arith.constant 0 : i32
    %c0_i32_0 = arith.constant 0 : i32
    return %arg0, %c0_i32 : i32, i32
  }
}

</mosaic_0001>

<bundles_post_ra>
// kernel: tpu_custom_call.1
= control target key start
LH: loop header
LB: loop body
LE: loop exit
PB: predicated region body
PF: predicated region fallthrough
CT: control target
= control target key end

     0   :  { %14 = vsyncpa [#allocation3], 0  ;;  %s715_s0 = inlined_call_operand.hbm [shape: f32[8,8], index: 0, kind: input, shape index: {}]   ;;  %s716_s1 = inlined_call_operand.hbm [shape: f32[8,256], index: 1, kind: input, shape index: {}]   ;;  %s717_s2 = inlined_call_operand.vmem [shape: f32[1,256], index: 2, kind: input, shape index: {}]   ;;  %s718_s3 = inlined_call_operand.hbm [shape: f32[256,256], index: 3, kind: input, shape index: {}]   ;;  %s719_s4 = inlined_call_operand.vmem [shape: f32[1,256], index: 4, kind: input, shape index: {}]   ;;  %s720_s5 = inlined_call_operand.hbm [shape: f32[256,128], index: 5, kind: input, shape index: {}]   ;;  %s721_s6 = inlined_call_operand.vmem [shape: f32[1,128], index: 6, kind: input, shape index: {}]   ;;  %s722_s7 = inlined_call_operand.vmem [shape: f32[1,128], index: 7, kind: input, shape index: {}]   ;;  %s723_s8 = inlined_call_operand.vmem [shape: f32[1,128], index: 8, kind: input, shape index: {}]   ;;  %s724_s9 = inlined_call_operand.hbm [shape: f32[8,128], index: 9, kind: output, shape index: {}]  }
   0x1   :  { %15 = vsyncpa [#allocation6], 0 }
   0x2   :  { %16 = vsyncpa [#allocation9], 0 }
   0x3   :  { %17 = vsyncpa [#allocation4], 0  ;;  %s625_s30 = smov [#allocation5]   ;;  %s626_s11 = smov [#allocation2]  }
   0x4   :  { %s34_s10 = sshll.u32 %s625_s30, 4  ;;  %s24_s12 = sshll.u32 %s626_s11, 4  ;;  %s35_s10 = int_to_ptr.vmem [resolvable:$true] %s34_s10  ;;  %s25_s12 = int_to_ptr.vmem [resolvable:$true] %s24_s12 }
   0x5   :  { %s525_s13 = scalar_lea.vmem %s35_s10, 256  ;;  %p530_p1 = scmp.lt.s32.totalorder %s35_s10, %s35_s10 }
   0x6   :  { %p526_p0 = scmp.ne.s32.totalorder %s35_s10, %s525_s13  ;;  %p531_p2 = scmp.lt.s32.totalorder %s525_s13, %s525_s13 }
   0x8   :  { %p532_p3 = por %p531_p2, %p530_p1 }
   0xa   :  { %p533_p4 = pnand %p532_p3, %p526_p0 }
   0xc   :  { %536 = shalt.err (!%p533_p4)
}
   0xd   :  { %37 = dma.hbm_to_vmem [thread:$0]  %s716_s1, 256, %s35_s10, [#allocation6]  }
   0xe   :  { %s545_s16 = scalar_lea.vmem %s25_s12, 128  ;;  %p550_p6 = scmp.lt.s32.totalorder %s25_s12, %s25_s12 }
   0xf   :  { %p546_p5 = scmp.ne.s32.totalorder %s25_s12, %s545_s16  ;;  %p551_p7 = scmp.lt.s32.totalorder %s545_s16, %s545_s16 }
  0x11   :  { %p552_p8 = por %p551_p7, %p550_p6 }
  0x13   :  { %p553_p9 = pnand %p552_p8, %p546_p5 }
  0x15   :  { %556 = shalt.err (!%p553_p9)
}
  0x16   :  { %27 = dma.hbm_to_vmem [thread:$0]  %s715_s0, 128, %s25_s12, [#allocation3]  }
  0x17   :  { %s627_s19 = smov [#allocation7]  }
  0x18   :  { %s45_s20 = sshll.u32 %s627_s19, 4  ;;  %s46_s20 = int_to_ptr.vmem [resolvable:$true] %s45_s20 }
  0x19   :  { %s565_s21 = scalar_lea.vmem %s46_s20, 8192  ;;  %p570_p11 = scmp.lt.s32.totalorder %s46_s20, %s46_s20 }
  0x1a   :  { %p566_p10 = scmp.ne.s32.totalorder %s46_s20, %s565_s21  ;;  %p571_p12 = scmp.lt.s32.totalorder %s565_s21, %s565_s21 }
  0x1c   :  { %p572_p13 = por %p571_p12, %p570_p11 }
  0x1e   :  { %p573_p0 = pnand %p572_p13, %p566_p10 }
  0x20   :  { %576 = shalt.err (!%p573_p0)
}
  0x21   :  { %s628_s1 = smov 256   ;;  %s629_s22 = smov 16  }
  0x22   :  { %51 = dma.hbm_to_vmem [thread:$0]  %s718_s3, 8192, %s46_s20, [#allocation6], %s628_s1, %s628_s1, %s629_s22  }
  0x23   :  { %s630_s25 = smov [#allocation8]  }
  0x24   :  { %s59_s26 = sshll.u32 %s630_s25, 4  ;;  %s60_s26 = int_to_ptr.vmem [resolvable:$true] %s59_s26 }
  0x25   :  { %s585_s0 = scalar_lea.vmem %s60_s26, 4096  ;;  %p590_p2 = scmp.lt.s32.totalorder %s60_s26, %s60_s26 }
  0x26   :  { %p586_p1 = scmp.ne.s32.totalorder %s60_s26, %s585_s0  ;;  %p591_p3 = scmp.lt.s32.totalorder %s585_s0, %s585_s0 }
  0x28   :  { %p592_p4 = por %p591_p3, %p590_p2 }
  0x2a   :  { %p593_p5 = pnand %p592_p4, %p586_p1 }
  0x2c   :  { %596 = shalt.err (!%p593_p5)
}
  0x2d   :  { %s631_s27 = smov 128   ;;  %s632_s28 = smov 8  }
  0x2e   :  { %65 = dma.hbm_to_vmem [thread:$0]  %s720_s5, 4096, %s60_s26, [#allocation9], %s631_s27, %s631_s27, %s632_s28  }
  0x2f   :  { %617 = dma.done.wait [#allocation3], 128  }
  0x30   :  { %618 = vsyncadd [#allocation3], 4294967168 }
  0x31   :  { %619 = dma.done.wait [#allocation6], 8448  }
  0x32   :  { %620 = vsyncadd [#allocation6], 4294958848 }
  0x33   :  { %621 = dma.done.wait [#allocation9], 4096  }
  0x34   :  { %622 = vsyncadd [#allocation9], 4294963200  ;;  %v633_v0 = vmov 0.0   ;;  %v86_v1 = vld [vmem:[#allocation5 + $0x8] sm:$0xff]  ;;  %v85_v2 = vld [vmem:[#allocation5] sm:$0xff]  ;;  %vm99_vm0 = vcmask 64512  }
  0x35   :  { %167 = vmatprep.mubr.f32.mxu0 %v633_v0  ;;  %v84_v3 = vld [vmem:[#allocation2] sm:$0xff]  ;;  %133 = vmatprep.subr.mxu0 %v86_v1  ;;  %v207_v4 = vld [vmem:[#allocation7 + $0xf8] sm:$0xff]  ;;  %v206_v5 = vld [vmem:[#allocation7 + $0xf0] sm:$0xff]  ;;  %s634_s16 = smov [#allocation10]  }
  0x36   :  { %v205_v6 = vld [vmem:[#allocation7 + $0xe8] sm:$0xff]  ;;  %134 = vmatpush1.msra.mxu0 %v85_v2  ;;  %252 = vmatprep.subr.mxu1 %v207_v4  ;;  %v204_v7 = vld [vmem:[#allocation7 + $0xe0] sm:$0xff]  ;;  %v203_v8 = vld [vmem:[#allocation7 + $0xd8] sm:$0xff]  ;;  %s457_s17 = sshll.u32 %s634_s16, 4  ;;  %s458_s17 = int_to_ptr.vmem [resolvable:$true] %s457_s17 }
  0x37   :  { %468 = vmatmul.mubr.msk.f32.vlgmr.msra.gmra.mxu0 %vm99_vm0, %v84_v3  ;;  %253 = vmatpush1.msra.mxu1 %v206_v5  ;;  %v202_v9 = vld [vmem:[#allocation7 + $0xd0] sm:$0xff]  ;;  %v201_v10 = vld [vmem:[#allocation7 + $0xc8] sm:$0xff]  ;;  %v200_v11 = vld [vmem:[#allocation7 + $0xc0] sm:$0xff]  ;;  %s597_s18 = scalar_lea.vmem %s458_s17, 128  ;;  %p602_p7 = scmp.lt.s32.totalorder %s458_s17, %s458_s17 }
  0x38   :  { %254 = vmatprep.subr.mxu1 %v205_v6  ;;  %v199_v12 = vld [vmem:[#allocation7 + $0xb8] sm:$0xff]  ;;  %v198_v13 = vld [vmem:[#allocation7 + $0xb0] sm:$0xff]  ;;  %v197_v14 = vld [vmem:[#allocation7 + $0xa8] sm:$0xff]  ;;  %p598_p6 = scmp.ne.s32.totalorder %s458_s17, %s597_s18  ;;  %p603_p8 = scmp.lt.s32.totalorder %s597_s18, %s597_s18 }
  0x39   :  { %255 = vmatpush1.msra.mxu1 %v204_v7  ;;  %v196_v15 = vld [vmem:[#allocation7 + $0xa0] sm:$0xff]  ;;  %v195_v16 = vld [vmem:[#allocation7 + $0x98] sm:$0xff]  ;;  %v194_v17 = vld [vmem:[#allocation7 + $0x90] sm:$0xff] }
  0x3a   :  { %256 = vmatprep.subr.mxu1 %v203_v8  ;;  %v193_v18 = vld [vmem:[#allocation7 + $0x88] sm:$0xff]  ;;  %v192_v19 = vld [vmem:[#allocation7 + $0x80] sm:$0xff]  ;;  %v191_v20 = vld [vmem:[#allocation7 + $0x78] sm:$0xff]  ;;  %p604_p9 = por %p603_p8, %p602_p7 }
  0x3b   :  { %257 = vmatpush1.msra.mxu1 %v202_v9  ;;  %v190_v21 = vld [vmem:[#allocation7 + $0x70] sm:$0xff]  ;;  %v189_v22 = vld [vmem:[#allocation7 + $0x68] sm:$0xff]  ;;  %v188_v23 = vld [vmem:[#allocation7 + $0x60] sm:$0xff] }
  0x3c   :  { %258 = vmatprep.subr.mxu1 %v201_v10  ;;  %v187_v24 = vld [vmem:[#allocation7 + $0x58] sm:$0xff]  ;;  %v186_v25 = vld [vmem:[#allocation7 + $0x50] sm:$0xff]  ;;  %v185_v26 = vld [vmem:[#allocation7 + $0x48] sm:$0xff]  ;;  %p605_p10 = pnand %p604_p9, %p598_p6 }
  0x3d   :  { %259 = vmatpush1.msra.mxu1 %v200_v11  ;;  %v184_v27 = vld [vmem:[#allocation7 + $0x40] sm:$0xff]  ;;  %v183_v28 = vld [vmem:[#allocation7 + $0x38] sm:$0xff]  ;;  %v182_v29 = vld [vmem:[#allocation7 + $0x30] sm:$0xff] }
  0x3e   :  { %260 = vmatprep.subr.mxu1 %v199_v12  ;;  %v181_v30 = vld [vmem:[#allocation7 + $0x28] sm:$0xff]  ;;  %v180_v31 = vld [vmem:[#allocation7 + $0x20] sm:$0xff]  ;;  %v179_v32 = vld [vmem:[#allocation7 + $0x18] sm:$0xff] }
  0x3f   :  { %261 = vmatpush1.msra.mxu1 %v198_v13  ;;  %v178_v33 = vld [vmem:[#allocation7 + $0x10] sm:$0xff]  ;;  %v177_v34 = vld [vmem:[#allocation7 + $0x8] sm:$0xff]  ;;  %v176_v35 = vld [vmem:[#allocation7] sm:$0xff] }
  0x40   :  { %262 = vmatprep.subr.mxu1 %v197_v14  ;;  %v239_v36 = vld [vmem:[#allocation7 + $0x1f8] sm:$0xff]  ;;  %v238_v37 = vld [vmem:[#allocation7 + $0x1f0] sm:$0xff]  ;;  %v237_v38 = vld [vmem:[#allocation7 + $0x1e8] sm:$0xff] }
  0x41   :  { %263 = vmatpush1.msra.mxu1 %v196_v15  ;;  %v236_v39 = vld [vmem:[#allocation7 + $0x1e0] sm:$0xff]  ;;  %v235_v40 = vld [vmem:[#allocation7 + $0x1d8] sm:$0xff]  ;;  %v234_v41 = vld [vmem:[#allocation7 + $0x1d0] sm:$0xff] }
  0x42   :  { %264 = vmatprep.subr.mxu1 %v195_v16  ;;  %v233_v42 = vld [vmem:[#allocation7 + $0x1c8] sm:$0xff]  ;;  %v232_v43 = vld [vmem:[#allocation7 + $0x1c0] sm:$0xff]  ;;  %v231_v44 = vld [vmem:[#allocation7 + $0x1b8] sm:$0xff] }
  0x43   :  { %265 = vmatpush1.msra.mxu1 %v194_v17  ;;  %v230_v45 = vld [vmem:[#allocation7 + $0x1b0] sm:$0xff]  ;;  %v229_v46 = vld [vmem:[#allocation7 + $0x1a8] sm:$0xff]  ;;  %v228_v47 = vld [vmem:[#allocation7 + $0x1a0] sm:$0xff] }
  0x44   :  { %266 = vmatprep.subr.mxu1 %v193_v18  ;;  %v227_v48 = vld [vmem:[#allocation7 + $0x198] sm:$0xff]  ;;  %v226_v49 = vld [vmem:[#allocation7 + $0x190] sm:$0xff]  ;;  %v225_v50 = vld [vmem:[#allocation7 + $0x188] sm:$0xff] }
  0x45   :  { %267 = vmatpush1.msra.mxu1 %v192_v19  ;;  %v224_v51 = vld [vmem:[#allocation7 + $0x180] sm:$0xff]  ;;  %v223_v52 = vld [vmem:[#allocation7 + $0x178] sm:$0xff]  ;;  %v222_v53 = vld [vmem:[#allocation7 + $0x170] sm:$0xff] }
  0x46   :  { %268 = vmatprep.subr.mxu1 %v191_v20  ;;  %v221_v54 = vld [vmem:[#allocation7 + $0x168] sm:$0xff]  ;;  %v220_v55 = vld [vmem:[#allocation7 + $0x160] sm:$0xff]  ;;  %v219_v56 = vld [vmem:[#allocation7 + $0x158] sm:$0xff] }
  0x47   :  { %269 = vmatpush1.msra.mxu1 %v190_v21  ;;  %v218_v57 = vld [vmem:[#allocation7 + $0x150] sm:$0xff]  ;;  %v217_v58 = vld [vmem:[#allocation7 + $0x148] sm:$0xff]  ;;  %v216_v59 = vld [vmem:[#allocation7 + $0x140] sm:$0xff] }
  0x48   :  { %270 = vmatprep.subr.mxu1 %v189_v22  ;;  %v215_v60 = vld [vmem:[#allocation7 + $0x138] sm:$0xff]  ;;  %v214_v61 = vld [vmem:[#allocation7 + $0x130] sm:$0xff]  ;;  %v213_v62 = vld [vmem:[#allocation7 + $0x128] sm:$0xff] }
  0x49   :  { %271 = vmatpush1.msra.mxu1 %v188_v23  ;;  %v212_v63 = vld [vmem:[#allocation7 + $0x120] sm:$0xff]  ;;  %v211_v0 = vld [vmem:[#allocation7 + $0x118] sm:$0xff]  ;;  %v210_v1 = vld [vmem:[#allocation7 + $0x110] sm:$0xff] }
  0x4a   :  { %272 = vmatprep.subr.mxu1 %v187_v24  ;;  %v209_v2 = vld [vmem:[#allocation7 + $0x108] sm:$0xff]  ;;  %v208_v3 = vld [vmem:[#allocation7 + $0x100] sm:$0xff]  ;;  %v356_v4 = vld [vmem:[#allocation8 + $0xf8] sm:$0xff] }
  0x4b   :  { %273 = vmatpush1.msra.mxu1 %v186_v25  ;;  %v340_v5 = vld [vmem:[#allocation8 + $0x78] sm:$0xff]  ;;  %v355_v6 = vld [vmem:[#allocation8 + $0xf0] sm:$0xff]  ;;  %472 = vmatprep.subr.mxu0 %v356_v4  ;;  %v354_v8 = vld [vmem:[#allocation8 + $0xe8] sm:$0xff] }
  0x4c   :  { %274 = vmatprep.subr.mxu1 %v185_v26  ;;  %v339_v7 = vld [vmem:[#allocation8 + $0x70] sm:$0xff]  ;;  %473 = vmatpush3.msra.mxu0 %v340_v5  ;;  %v338_v9 = vld [vmem:[#allocation8 + $0x68] sm:$0xff]  ;;  %v353_v10 = vld [vmem:[#allocation8 + $0xe0] sm:$0xff] }
  0x4d   :  { %275 = vmatpush1.msra.mxu1 %v184_v27  ;;  %474 = vmatprep.subr.mxu0 %v355_v6  ;;  %v337_v11 = vld [vmem:[#allocation8 + $0x60] sm:$0xff]  ;;  %v352_v12 = vld [vmem:[#allocation8 + $0xd8] sm:$0xff]  ;;  %v351_v14 = vld [vmem:[#allocation8 + $0xd0] sm:$0xff] }
  0x4e   :  { %276 = vmatprep.subr.mxu1 %v183_v28  ;;  %475 = vmatpush3.msra.mxu0 %v339_v7  ;;  %v336_v13 = vld [vmem:[#allocation8 + $0x58] sm:$0xff]  ;;  %v335_v15 = vld [vmem:[#allocation8 + $0x50] sm:$0xff]  ;;  %v350_v16 = vld [vmem:[#allocation8 + $0xc8] sm:$0xff]  ;;  %v89_v28 = vlaneseq }
  0x4f   :  { %277 = vmatpush1.msra.mxu1 %v182_v29  ;;  %476 = vmatprep.subr.mxu0 %v354_v8  ;;  %v334_v17 = vld [vmem:[#allocation8 + $0x48] sm:$0xff]  ;;  %v349_v18 = vld [vmem:[#allocation8 + $0xc0] sm:$0xff]  ;;  %v348_v20 = vld [vmem:[#allocation8 + $0xb8] sm:$0xff] }
  0x50   :  { %278 = vmatprep.subr.mxu1 %v181_v30  ;;  %477 = vmatpush3.msra.mxu0 %v338_v9  ;;  %v333_v19 = vld [vmem:[#allocation8 + $0x40] sm:$0xff]  ;;  %v332_v21 = vld [vmem:[#allocation8 + $0x38] sm:$0xff]  ;;  %v347_v22 = vld [vmem:[#allocation8 + $0xb0] sm:$0xff]  ;;  %v90_v29 = vshrl.u32 %v89_v28, 7 }
  0x51   :  { %279 = vmatpush1.msra.mxu1 %v180_v31  ;;  %478 = vmatprep.subr.mxu0 %v353_v10  ;;  %v331_v23 = vld [vmem:[#allocation8 + $0x30] sm:$0xff]  ;;  %v346_v24 = vld [vmem:[#allocation8 + $0xa8] sm:$0xff]  ;;  %v345_v26 = vld [vmem:[#allocation8 + $0xa0] sm:$0xff] }
  0x52   :  { %280 = vmatprep.subr.mxu1 %v179_v32  ;;  %479 = vmatpush3.msra.mxu0 %v337_v11  ;;  %v330_v25 = vld [vmem:[#allocation8 + $0x28] sm:$0xff]  ;;  %v329_v27 = vld [vmem:[#allocation8 + $0x20] sm:$0xff]  ;;  %v91_v30 = vsub.s32 0, %v90_v29  ;;  %v95_v32 = vsub.s32 1, %v90_v29 }
  0x53   :  { %281 = vmatpush1.msra.mxu1 %v178_v33  ;;  %480 = vmatprep.subr.mxu0 %v352_v12  ;;  %v87_v31 = vld [vmem:[%s717_s2] sm:$0x3] }
  0x54   :  { %282 = vmatprep.subr.mxu1 %v177_v34  ;;  %481 = vmatpush3.msra.mxu0 %v336_v13  ;;  %v92_v33 = vrot.slane %v87_v31, %v91_v30  ;;  %v96_v34 = vrot.slane %v87_v31, %v95_v32 }
  0x55   :  { %283 = vmatpush1.msra.mxu1 %v176_v35  ;;  %482 = vmatprep.subr.mxu0 %v351_v14 }
  0x56   :  { %284 = vmatprep.subr.mxu1 %v239_v36  ;;  %483 = vmatpush3.msra.mxu0 %v335_v15 }
  0x57   :  { %285 = vmatpush2.msra.mxu1 %v238_v37  ;;  %484 = vmatprep.subr.mxu0 %v350_v16 }
  0x58   :  { %286 = vmatprep.subr.mxu1 %v237_v38  ;;  %485 = vmatpush3.msra.mxu0 %v334_v17 }
  0x59   :  { %287 = vmatpush2.msra.mxu1 %v236_v39  ;;  %486 = vmatprep.subr.mxu0 %v349_v18 }
  0x5a   :  { %288 = vmatprep.subr.mxu1 %v235_v40  ;;  %487 = vmatpush3.msra.mxu0 %v333_v19 }
  0x5b   :  { %289 = vmatpush2.msra.mxu1 %v234_v41  ;;  %488 = vmatprep.subr.mxu0 %v348_v20  ;;  %v344_v41 = vld [vmem:[#allocation8 + $0x98] sm:$0xff] }
  0x5c   :  { %290 = vmatprep.subr.mxu1 %v233_v42  ;;  %489 = vmatpush3.msra.mxu0 %v332_v21  ;;  %v328_v42 = vld [vmem:[#allocation8 + $0x18] sm:$0xff] }
  0x5d   :  { %291 = vmatpush2.msra.mxu1 %v232_v43  ;;  %490 = vmatprep.subr.mxu0 %v347_v22  ;;  %v343_v43 = vld [vmem:[#allocation8 + $0x90] sm:$0xff] }
  0x5e   :  { %292 = vmatprep.subr.mxu1 %v231_v44  ;;  %491 = vmatpush3.msra.mxu0 %v331_v23  ;;  %v327_v44 = vld [vmem:[#allocation8 + $0x10] sm:$0xff] }
  0x5f   :  { %293 = vmatpush2.msra.mxu1 %v230_v45  ;;  %492 = vmatprep.subr.mxu0 %v346_v24  ;;  %v342_v45 = vld [vmem:[#allocation8 + $0x88] sm:$0xff] }
  0x60   :  { %294 = vmatprep.subr.mxu1 %v229_v46  ;;  %493 = vmatpush3.msra.mxu0 %v330_v25  ;;  %v326_v46 = vld [vmem:[#allocation8 + $0x8] sm:$0xff] }
  0x61   :  { %295 = vmatpush2.msra.mxu1 %v228_v47  ;;  %494 = vmatprep.subr.mxu0 %v345_v26  ;;  %v341_v47 = vld [vmem:[#allocation8 + $0x80] sm:$0xff] }
  0x62   :  { %296 = vmatprep.subr.mxu1 %v227_v48  ;;  %495 = vmatpush3.msra.mxu0 %v329_v27  ;;  %v325_v48 = vld [vmem:[#allocation8] sm:$0xff] }
  0x63   :  { %297 = vmatpush2.msra.mxu1 %v226_v49  ;;  %496 = vmatprep.subr.mxu0 %v344_v41  ;;  %v240_v49 = vld [vmem:[%s719_s4] sm:$0x3] }
  0x64   :  { %298 = vmatprep.subr.mxu1 %v225_v50  ;;  %497 = vmatpush3.msra.mxu0 %v328_v42  ;;  %v245_v50 = vrot.slane %v240_v49, %v91_v30 }
  0x65   :  { %299 = vmatpush2.msra.mxu1 %v224_v51  ;;  %498 = vmatprep.subr.mxu0 %v343_v43  ;;  %v249_v51 = vrot.slane %v240_v49, %v95_v32 }
  0x66   :  { %300 = vmatprep.subr.mxu1 %v223_v52  ;;  %499 = vmatpush3.msra.mxu0 %v327_v44 }
  0x67   :  { %301 = vmatpush2.msra.mxu1 %v222_v53  ;;  %500 = vmatprep.subr.mxu0 %v342_v45 }
  0x68   :  { %302 = vmatprep.subr.mxu1 %v221_v54  ;;  %501 = vmatpush3.msra.mxu0 %v326_v46 }
  0x69   :  { %303 = vmatpush2.msra.mxu1 %v220_v55  ;;  %502 = vmatprep.subr.mxu0 %v341_v47 }
  0x6a   :  { %304 = vmatprep.subr.mxu1 %v219_v56  ;;  %503 = vmatpush3.msra.mxu0 %v325_v48 }
  0x6b   :  { %305 = vmatpush2.msra.mxu1 %v218_v57 }
  0x6c   :  { %306 = vmatprep.subr.mxu1 %v217_v58 }
  0x6d   :  { %307 = vmatpush2.msra.mxu1 %v216_v59  ;;  %v469_v59 = vld [vmem:[%s721_s6] ss:$0 sm:$0xff] }
  0x6e   :  { %308 = vmatprep.subr.mxu1 %v215_v60 }
  0x6f   :  { %309 = vmatpush2.msra.mxu1 %v214_v61 }
  0x70   :  { %310 = vmatprep.subr.mxu1 %v213_v62  ;;  %v470_v62 = vld [vmem:[%s722_s7] ss:$0 sm:$0xff] }
  0x71   :  { %311 = vmatpush2.msra.mxu1 %v212_v63 }
  0x72   :  { %312 = vmatprep.subr.mxu1 %v211_v0  ;;  %v471_v0 = vld [vmem:[%s723_s8] ss:$0 sm:$0xff] }
  0x73   :  { %313 = vmatpush2.msra.mxu1 %v210_v1 }
  0x74   :  { %314 = vmatprep.subr.mxu1 %v209_v2 }
  0x75   :  { %315 = vmatpush2.msra.mxu1 %v208_v3 }
  0xf7   :  { %v169_v35 = vpop.f32.mrf.mxu0 }
  0xf8   :  { %v170_v36 = vadd.f32 %v169_v35, %v92_v33 }
  0xf9   :  { %v171_v37 = vpop.f32.mrf.mxu0 }
  0xfa   :  { %v172_v38 = vadd.f32 %v171_v37, %v96_v34  ;;  %v174_v40 = vmax.f32 %v170_v36, 0.0 }
  0xfc   :  { %v175_v39 = vmax.f32 %v172_v38, 0.0 }
  0xfe   :  { %316 = vmatprep.mubr.f32.mxu1 %v175_v39 }
  0xff   :  { %317 = vmatmul.mubr.f32.vlgmr.msra.gmra.mxu1 %v174_v40 }
 0x1bf   :  { %v318_v52 = vpop.f32.mrf.mxu1 }
 0x1c0   :  { %v319_v53 = vadd.f32 %v318_v52, %v245_v50 }
 0x1c1   :  { %v320_v54 = vpop.f32.mrf.mxu1 }
 0x1c2   :  { %v321_v55 = vadd.f32 %v320_v54, %v249_v51  ;;  %v323_v57 = vmax.f32 %v319_v53, 0.0 }
 0x1c4   :  { %v324_v56 = vmax.f32 %v321_v55, 0.0 }
 0x1c6   :  { %428 = vmatprep.mubr.f32.mxu0 %v324_v56 }
 0x1c7   :  { %429 = vmatmul.mubr.f32.vlgmr.msra.gmra.mxu0 %v323_v57 }
 0x287   :  { %v504_v58 = vpop.f32.mrf.mxu0 }
 0x289   :  { %v505_v60 = vpop.f32.mrf.mxu0 }
 0x28a   :  { %v506_v61 = vadd.f32 %v505_v60, %v504_v58 }
 0x28c   :  { %v431_v63 = vadd.f32 %v506_v61, %v469_v59 }
 0x28e   :  { %v441_v1 = vmax.f32 %v431_v63, %v470_v62 }
 0x290   :  { %v449_v2 = vmin.f32 %v441_v1, %v471_v0 }
 0x292   :  { %450 = vst [vmem:[#allocation10] sm:$0xff] %v449_v2 }
 0x293   :  { %608 = shalt.err (!%p605_p10)
}
 0x294   :  { %460 = dma.vmem_to_hbm [thread:$0]  %s458_s17, 128, %s724_s9, [#allocation4]  }
 0x295   :  { %623 = dma.done.wait [#allocation4], 128  }
 0x296   :  { %624 = vsyncadd [#allocation4], 4294967168 }
 0x297   :  { %464 = vsyncpa [#allocation3], 1 }
 0x298   :  { %465 = vsyncpa [#allocation6], 1 }
 0x299   :  { %466 = vsyncpa [#allocation9], 1 }
 0x29a   :  { %467 = vsyncpa [#allocation4], 1 }

</bundles_post_ra>
